<compile_context>
chip_gen: v6e
topology: v6e:2x2x1
jax: 0.10.0
libtpu: 0.0.40
codegen_flags: <defaults>
</compile_context>

<pallas_src>
import functools

import jax
import jax.numpy as jnp
from jax.experimental import pallas as pl
from jax.experimental.pallas import tpu as pltpu


_NEG_INF = -1e30  # finite "minus infinity" for masked (padded) keys


def _flash_attn_kernel(q_ref, k_ref, v_ref, o_ref,
                       q_sc, m_sc, l_sc, acc_sc, *,
                       scale, heads, dim_head, n_orig, tile, mask_keys):
    """Fused softmax(Q K^T * scale) V over packed 'b n (h d)' blocks.

    Block shapes (inner = heads * dim_head):
      q_ref / o_ref : (1, tile, inner)   current (batch, q-tile) block
      k_ref / v_ref : (1, tile, inner)   current (batch, kv-tile) block
    Scratch (persists across the kv grid axis):
      q_sc   : (tile, inner)  input dtype  scaled q, written once per q tile
      m_sc   : (heads, tile, 1)       f32  running row max
      l_sc   : (heads, tile, 1)       f32  running softmax denominator
      acc_sc : (heads, tile, dim_head) f32 running numerator
    """
    kv = pl.program_id(2)

    @pl.when(kv == 0)
    def _init():
        # Scale q once per q tile: f32 multiply, single cast back to the MXU
        # operand dtype (no per-kv-step rescaling / recasting).
        q_sc[...] = (q_ref[0].astype(jnp.float32) * scale).astype(q_sc.dtype)
        m_sc[...] = jnp.full(m_sc.shape, -jnp.inf, dtype=jnp.float32)
        l_sc[...] = jnp.zeros(l_sc.shape, dtype=jnp.float32)
        acc_sc[...] = jnp.zeros(acc_sc.shape, dtype=jnp.float32)

    # Native-dtype MXU operands (bf16 in -> bf16 operands), f32 accumulate.
    q_all = q_sc[...]          # (tile, inner), already scaled
    k_all = k_ref[0]           # (tile, inner)
    v_all = v_ref[0]           # (tile, inner)

    if mask_keys:
        key_idx = kv * tile + jax.lax.broadcasted_iota(jnp.int32, (tile, tile), 1)
        key_valid = key_idx < n_orig          # (tile, tile) bool

    for h in range(heads):                     # static loop: heads is compile-time
        lo = h * dim_head
        q_h = q_all[:, lo:lo + dim_head]       # (tile, dh)
        k_h = k_all[:, lo:lo + dim_head]       # (tile, dh)
        v_h = v_all[:, lo:lo + dim_head]       # (tile, dh)

        # s = (q * scale) @ k^T  -> (tile, tile), f32 accumulation on the MXU.
        s = jax.lax.dot_general(q_h, k_h, (((1,), (1,)), ((), ())),
                                preferred_element_type=jnp.float32)
        if mask_keys:
            s = jnp.where(key_valid, s, _NEG_INF)

        # --- online softmax update (all f32 on the VPU/EUP) ---
        m_prev = m_sc[h]                                        # (tile, 1)
        m_new = jnp.maximum(m_prev, s.max(axis=-1, keepdims=True))
        alpha = jnp.exp(m_prev - m_new)
        p = jnp.exp(s - m_new)                                  # (tile, tile) f32
        if mask_keys:
            p = jnp.where(key_valid, p, 0.0)                    # padded keys contribute 0

        l_sc[h] = alpha * l_sc[h] + p.sum(axis=-1, keepdims=True)
        acc_sc[h] = alpha * acc_sc[h] + jnp.dot(
            p.astype(v_h.dtype), v_h, preferred_element_type=jnp.float32)
        m_sc[h] = m_new

    @pl.when(kv == pl.num_programs(2) - 1)
    def _finalize():
        # Output block is the packed 'b n (h d)' slab (lane-dense when
        # inner >= 128); each head writes its lane range once.
        for h in range(heads):
            lo = h * dim_head
            l_h = l_sc[h]
            inv = pl.reciprocal(l_h, approx=True)    # EUP slot, otherwise idle here
            inv = inv * (2.0 - l_h * inv)            # one Newton step for accuracy
            o_ref[0, :, lo:lo + dim_head] = (acc_sc[h] * inv).astype(o_ref.dtype)


def _round_up(x, m):
    return (x + m - 1) // m * m


def _choose_tile(n, preferred=256):
    """Sequence tile (second-to-last block dim): prefer 256/128; otherwise pad."""
    for t in (preferred, 128):
        if n >= t and n % t == 0:
            return t
    if n >= preferred:
        return preferred                 # pad n up to a multiple of `preferred`
    return _round_up(n, 8)               # short sequence: one sublane-aligned tile


def _flash_attention(q, k, v, *, heads, dim_head, scale, tile=None):
    """q, k, v: (B, N, heads*dim_head) packed 'b n (h d)' -> same layout out."""
    B, N, inner = q.shape
    assert inner == heads * dim_head
    t = tile if tile is not None else _choose_tile(N)   # sweep per generation
    n_pad = _round_up(N, t)

    if n_pad != N:
        pad = ((0, 0), (0, n_pad - N), (0, 0))
        q = jnp.pad(q, pad)
        k = jnp.pad(k, pad)
        v = jnp.pad(v, pad)
    mask_keys = n_pad != N

    kernel = functools.partial(
        _flash_attn_kernel, scale=scale, heads=heads, dim_head=dim_head,
        n_orig=N, tile=t, mask_keys=mask_keys)

    out = pl.pallas_call(
        kernel,
        out_shape=jax.ShapeDtypeStruct((B, n_pad, inner), q.dtype),
        grid_spec=pltpu.PrefetchScalarGridSpec(
            num_scalar_prefetch=0,
            grid=(B, n_pad // t, n_pad // t),
            in_specs=[
                pl.BlockSpec((1, t, inner), lambda b, i, j: (b, i, 0)),   # q
                pl.BlockSpec((1, t, inner), lambda b, i, j: (b, j, 0)),   # k
                pl.BlockSpec((1, t, inner), lambda b, i, j: (b, j, 0)),   # v
            ],
            out_specs=pl.BlockSpec((1, t, inner), lambda b, i, j: (b, i, 0)),
            scratch_shapes=[
                pltpu.VMEM((t, inner), q.dtype),              # scaled q cache
                pltpu.VMEM((heads, t, 1), jnp.float32),       # m
                pltpu.VMEM((heads, t, 1), jnp.float32),       # l
                pltpu.VMEM((heads, t, dim_head), jnp.float32),  # acc
            ],
        ),
        compiler_params=pltpu.CompilerParams(
            # kv axis innermost + "arbitrary" so the accumulator stays resident;
            # batch / q-tile axes "parallel" for megacore sharding (keep the
            # batch extent >= 2 / even on v7x so both TensorCores get work).
            dimension_semantics=("parallel", "parallel", "arbitrary"),
        ),
    )(q, k, v)

    if n_pad != N:
        out = out[:, :N, :]
    return out


def attention_forward(x, w_qkv, w_out, b_out, *, heads, dim_head):
    """x: (B, N, dim); w_qkv: (dim, 3*inner); w_out: (inner, dim) or None; b_out: (dim,) or None."""
    B, N, dim = x.shape
    inner = heads * dim_head
    scale = float(dim_head) ** -0.5

    # --- to_qkv: ordinary GEMM, hoisted to XLA ---
    qkv = jnp.dot(x, w_qkv)                          # (B, N, 3*inner)
    q, k, v = jnp.split(qkv, 3, axis=-1)             # each (B, N, inner), packed 'b n (h d)'

    # --- fused flash-attention core (no head transposes; packed layout in/out) ---
    out = _flash_attention(q, k, v, heads=heads, dim_head=dim_head, scale=scale)

    # --- to_out projection (nn.Identity when heads == 1 and dim_head == dim) ---
    if w_out is not None:
        out = jnp.dot(out, w_out) + b_out
    # TODO(synk): nn.Dropout is a no-op in eval mode (and p=0.0 by default); not implemented.
    return out


def _reference(x, w_qkv, w_out, b_out, *, heads, dim_head):
    B, N, dim = x.shape
    inner = heads * dim_head
    scale = float(dim_head) ** -0.5
    qkv = jnp.dot(x, w_qkv)
    q, k, v = jnp.split(qkv, 3, axis=-1)

    def rh(t):
        return t.reshape(B, N, heads, dim_head).transpose(0, 2, 1, 3)

    q, k, v = rh(q), rh(k), rh(v)
    dots = jnp.einsum('bhnd,bhmd->bhnm', q, k,
                      preferred_element_type=jnp.float32) * scale
    attn = jax.nn.softmax(dots, axis=-1)
    out = jnp.einsum('bhnm,bhmd->bhnd', attn, v,
                     preferred_element_type=jnp.float32)
    out = out.transpose(0, 2, 1, 3).reshape(B, N, inner)
    if w_out is not None:
        out = jnp.dot(out, w_out) + b_out
    return out


def _run_case(key, B, N, dim, heads, dim_head):
    inner = heads * dim_head
    project_out = not (heads == 1 and dim_head == dim)
    kx, kq, ko, kb = jax.random.split(key, 4)
    x = jax.random.normal(kx, (B, N, dim), dtype=jnp.float32)
    w_qkv = jax.random.normal(kq, (dim, 3 * inner), dtype=jnp.float32) * (dim ** -0.5)
    if project_out:
        w_out = jax.random.normal(ko, (inner, dim), dtype=jnp.float32) * (inner ** -0.5)
        b_out = jax.random.normal(kb, (dim,), dtype=jnp.float32) * 0.1
    else:
        w_out, b_out = None, None

    out = attention_forward(x, w_qkv, w_out, b_out, heads=heads, dim_head=dim_head)
    out = jax.block_until_ready(out)

    ref = _reference(x, w_qkv, w_out, b_out, heads=heads, dim_head=dim_head)
    assert out.shape == (B, N, dim if project_out else inner)
    assert jnp.allclose(out, ref, atol=2e-3, rtol=2e-3), "mismatch vs pure-JAX reference"


if __name__ == "__main__":
    key = jax.random.PRNGKey(0)
    k1, k2 = jax.random.split(key)

    # Primary case (module-consistent small shapes): batch=2, seq=8, dim=32,
    # heads=2, dim_head=16 -> inner_dim=32, project_out=True.
    _run_case(k1, B=2, N=8, dim=32, heads=2, dim_head=16)

    # Secondary case: non-8-divisible sequence (exercises padding + key masking)
    # and the nn.Identity to_out branch (heads=1, dim_head=dim).
    _run_case(k2, B=1, N=10, dim=32, heads=1, dim_head=32)

    print("KERNEL_OK")
</pallas_src>

<mosaic_0001>
module attributes {stable_mosaic.version = 11 : i64} {
  func.func @_flash_attn_kernel(%arg0: i32, %arg1: i32, %arg2: i32, %arg3: memref<1x8x32xf32, #tpu.memory_space<vmem>>, %arg4: memref<1x8x32xf32, #tpu.memory_space<vmem>>, %arg5: memref<1x8x32xf32, #tpu.memory_space<vmem>>, %arg6: memref<1x8x32xf32, #tpu.memory_space<vmem>>, %arg7: memref<8x32xf32, #tpu.memory_space<vmem>>, %arg8: memref<2x8x1xf32, #tpu.memory_space<vmem>>, %arg9: memref<2x8x1xf32, #tpu.memory_space<vmem>>, %arg10: memref<2x8x16xf32, #tpu.memory_space<vmem>>) attributes {dimension_semantics = [#tpu.dimension_semantics<parallel>, #tpu.dimension_semantics<parallel>, #tpu.dimension_semantics<arbitrary>], iteration_bounds = array<i64: 2, 1, 1>, scalar_prefetch = 0 : i64, scratch_operands = 4 : i64, tpu.core_type = #tpu.core_type<tc>, window_params = [{transform_indices = @transform_0, window_bounds = array<i64: 1, 8, 32>}, {transform_indices = @transform_1, window_bounds = array<i64: 1, 8, 32>}, {transform_indices = @transform_2, window_bounds = array<i64: 1, 8, 32>}, {transform_indices = @transform_3, window_bounds = array<i64: 1, 8, 32>}]} {
    %c0_i32 = arith.constant 0 : i32
    %0 = arith.cmpi eq, %arg2, %c0_i32 : i32
    %1 = arith.extui %0 : i1 to i32
    %c0_i32_0 = arith.constant 0 : i32
    %2 = arith.cmpi ne, %1, %c0_i32_0 : i32
    scf.if %2 {
      %c0_52 = arith.constant 0 : index
      %c0_53 = arith.constant 0 : index
      %c0_54 = arith.constant 0 : index
      %81 = vector.load %arg3[%c0_52, %c0_53, %c0_54] : memref<1x8x32xf32, #tpu.memory_space<vmem>>, vector<1x8x32xf32>
      %82 = vector.shape_cast %81 : vector<1x8x32xf32> to vector<8x32xf32>
      %cst_55 = arith.constant 2.500000e-01 : f32
      %83 = vector.broadcast %cst_55 : f32 to vector<8x32xf32>
      %84 = arith.mulf %82, %83 : vector<8x32xf32>
      %c0_56 = arith.constant 0 : index
      %c0_57 = arith.constant 0 : index
      %85 = vector.load %arg7[%c0_56, %c0_57] : memref<8x32xf32, #tpu.memory_space<vmem>>, vector<8x32xf32>
      tpu.vector_store %arg7[%c0_56, %c0_57], %84 {strides = array<i32>} : memref<8x32xf32, #tpu.memory_space<vmem>>, vector<8x32xf32>,
      %cst_58 = arith.constant 0xFF800000 : f32
      %86 = vector.broadcast %cst_58 : f32 to vector<2x8x1xf32>
      %c0_59 = arith.constant 0 : index
      %c0_60 = arith.constant 0 : index
      %c0_61 = arith.constant 0 : index
      %87 = vector.load %arg8[%c0_59, %c0_60, %c0_61] : memref<2x8x1xf32, #tpu.memory_space<vmem>>, vector<2x8x1xf32>
      tpu.vector_store %arg8[%c0_59, %c0_60, %c0_61], %86 {strides = array<i32>} : memref<2x8x1xf32, #tpu.memory_space<vmem>>, vector<2x8x1xf32>,
      %cst_62 = arith.constant 0.000000e+00 : f32
      %88 = vector.broadcast %cst_62 : f32 to vector<2x8x1xf32>
      %c0_63 = arith.constant 0 : index
      %c0_64 = arith.constant 0 : index
      %c0_65 = arith.constant 0 : index
      %89 = vector.load %arg9[%c0_63, %c0_64, %c0_65] : memref<2x8x1xf32, #tpu.memory_space<vmem>>, vector<2x8x1xf32>
      tpu.vector_store %arg9[%c0_63, %c0_64, %c0_65], %88 {strides = array<i32>} : memref<2x8x1xf32, #tpu.memory_space<vmem>>, vector<2x8x1xf32>,
      %cst_66 = arith.constant 0.000000e+00 : f32
      %90 = vector.broadcast %cst_66 : f32 to vector<2x8x16xf32>
      %c0_67 = arith.constant 0 : index
      %c0_68 = arith.constant 0 : index
      %c0_69 = arith.constant 0 : index
      %91 = vector.load %arg10[%c0_67, %c0_68, %c0_69] : memref<2x8x16xf32, #tpu.memory_space<vmem>>, vector<2x8x16xf32>
      tpu.vector_store %arg10[%c0_67, %c0_68, %c0_69], %90 {strides = array<i32>} : memref<2x8x16xf32, #tpu.memory_space<vmem>>, vector<2x8x16xf32>,
    } else {
    }
    %c0 = arith.constant 0 : index
    %c0_1 = arith.constant 0 : index
    %3 = vector.load %arg7[%c0, %c0_1] : memref<8x32xf32, #tpu.memory_space<vmem>>, vector<8x32xf32>
    %c0_2 = arith.constant 0 : index
    %c0_3 = arith.constant 0 : index
    %c0_4 = arith.constant 0 : index
    %4 = vector.load %arg4[%c0_2, %c0_3, %c0_4] : memref<1x8x32xf32, #tpu.memory_space<vmem>>, vector<1x8x32xf32>
    %5 = vector.shape_cast %4 : vector<1x8x32xf32> to vector<8x32xf32>
    %c0_5 = arith.constant 0 : index
    %c0_6 = arith.constant 0 : index
    %c0_7 = arith.constant 0 : index
    %6 = vector.load %arg5[%c0_5, %c0_6, %c0_7] : memref<1x8x32xf32, #tpu.memory_space<vmem>>, vector<1x8x32xf32>
    %7 = vector.shape_cast %6 : vector<1x8x32xf32> to vector<8x32xf32>
    %8 = vector.extract_strided_slice %3 {offsets = [0, 0], sizes = [8, 16], strides = [1, 1]} : vector<8x32xf32> to vector<8x16xf32>
    %9 = vector.extract_strided_slice %5 {offsets = [0, 0], sizes = [8, 16], strides = [1, 1]} : vector<8x32xf32> to vector<8x16xf32>
    %10 = vector.extract_strided_slice %7 {offsets = [0, 0], sizes = [8, 16], strides = [1, 1]} : vector<8x32xf32> to vector<8x16xf32>
    %cst = arith.constant dense<0.000000e+00> : vector<8x8xf32>
    %11 = tpu.matmul %8, %9, %cst {dimension_numbers = #tpu.dot_dimension_numbers<[1], [1], [0], [0], [0, 0, 1, 0], [], []>} : vector<8x16xf32>, vector<8x16xf32>, vector<8x8xf32> -> vector<8x8xf32>
    %c0_8 = arith.constant 0 : index
    %c0_9 = arith.constant 0 : index
    %c0_10 = arith.constant 0 : index
    %12 = vector.load %arg8[%c0_8, %c0_9, %c0_10] : memref<2x8x1xf32, #tpu.memory_space<vmem>>, vector<1x8x1xf32>
    %13 = vector.shape_cast %12 : vector<1x8x1xf32> to vector<8x1xf32>
    %cst_11 = arith.constant dense<0xFF800000> : vector<8xf32>
    %14 = vector.multi_reduction <maximumf>, %11, %cst_11 [1] : vector<8x8xf32> to vector<8xf32>
    %15 = vector.shape_cast %14 : vector<8xf32> to vector<8x1xf32>
    %16 = arith.maximumf %13, %15 : vector<8x1xf32>
    %17 = arith.subf %13, %16 : vector<8x1xf32>
    %18 = math.exp %17 : vector<8x1xf32>
    %19 = vector.broadcast %16 : vector<8x1xf32> to vector<8x8xf32>
    %20 = arith.subf %11, %19 : vector<8x8xf32>
    %21 = math.exp %20 : vector<8x8xf32>
    %c0_12 = arith.constant 0 : index
    %c0_13 = arith.constant 0 : index
    %c0_14 = arith.constant 0 : index
    %22 = vector.load %arg9[%c0_12, %c0_13, %c0_14] : memref<2x8x1xf32, #tpu.memory_space<vmem>>, vector<1x8x1xf32>
    %23 = vector.shape_cast %22 : vector<1x8x1xf32> to vector<8x1xf32>
    %24 = arith.mulf %18, %23 : vector<8x1xf32>
    %cst_15 = arith.constant dense<0.000000e+00> : vector<8xf32>
    %25 = vector.multi_reduction <add>, %21, %cst_15 [1] : vector<8x8xf32> to vector<8xf32>
    %26 = vector.shape_cast %25 : vector<8xf32> to vector<8x1xf32>
    %27 = arith.addf %24, %26 : vector<8x1xf32>
    %c0_16 = arith.constant 0 : index
    %c0_17 = arith.constant 0 : index
    %c0_18 = arith.constant 0 : index
    %28 = vector.load %arg9[%c0_16, %c0_17, %c0_18] : memref<2x8x1xf32, #tpu.memory_space<vmem>>, vector<1x8x1xf32>
    %29 = vector.shape_cast %28 : vector<1x8x1xf32> to vector<8x1xf32>
    %30 = vector.shape_cast %27 : vector<8x1xf32> to vector<1x8x1xf32>
    tpu.vector_store %arg9[%c0_16, %c0_17, %c0_18], %30 {strides = array<i32>} : memref<2x8x1xf32, #tpu.memory_space<vmem>>, vector<1x8x1xf32>,
    %c0_19 = arith.constant 0 : index
    %c0_20 = arith.constant 0 : index
    %c0_21 = arith.constant 0 : index
    %31 = vector.load %arg10[%c0_19, %c0_20, %c0_21] : memref<2x8x16xf32, #tpu.memory_space<vmem>>, vector<1x8x16xf32>
    %32 = vector.shape_cast %31 : vector<1x8x16xf32> to vector<8x16xf32>
    %33 = vector.broadcast %18 : vector<8x1xf32> to vector<8x16xf32>
    %34 = arith.mulf %33, %32 : vector<8x16xf32>
    %cst_22 = arith.constant dense<0.000000e+00> : vector<8x16xf32>
    %35 = tpu.matmul %21, %10, %cst_22 {dimension_numbers = #tpu.dot_dimension_numbers<[1], [0], [0], [1], [0, 0, 1, 1], [], []>} : vector<8x8xf32>, vector<8x16xf32>, vector<8x16xf32> -> vector<8x16xf32>
    %36 = arith.addf %34, %35 : vector<8x16xf32>
    %c0_23 = arith.constant 0 : index
    %c0_24 = arith.constant 0 : index
    %c0_25 = arith.constant 0 : index
    %37 = vector.load %arg10[%c0_23, %c0_24, %c0_25] : memref<2x8x16xf32, #tpu.memory_space<vmem>>, vector<1x8x16xf32>
    %38 = vector.shape_cast %37 : vector<1x8x16xf32> to vector<8x16xf32>
    %39 = vector.shape_cast %36 : vector<8x16xf32> to vector<1x8x16xf32>
    tpu.vector_store %arg10[%c0_23, %c0_24, %c0_25], %39 {strides = array<i32>} : memref<2x8x16xf32, #tpu.memory_space<vmem>>, vector<1x8x16xf32>,
    %c0_26 = arith.constant 0 : index
    %c0_27 = arith.constant 0 : index
    %c0_28 = arith.constant 0 : index
    %40 = vector.load %arg8[%c0_26, %c0_27, %c0_28] : memref<2x8x1xf32, #tpu.memory_space<vmem>>, vector<1x8x1xf32>
    %41 = vector.shape_cast %40 : vector<1x8x1xf32> to vector<8x1xf32>
    %42 = vector.shape_cast %16 : vector<8x1xf32> to vector<1x8x1xf32>
    tpu.vector_store %arg8[%c0_26, %c0_27, %c0_28], %42 {strides = array<i32>} : memref<2x8x1xf32, #tpu.memory_space<vmem>>, vector<1x8x1xf32>,
    %43 = vector.extract_strided_slice %3 {offsets = [0, 16], sizes = [8, 16], strides = [1, 1]} : vector<8x32xf32> to vector<8x16xf32>
    %44 = vector.extract_strided_slice %5 {offsets = [0, 16], sizes = [8, 16], strides = [1, 1]} : vector<8x32xf32> to vector<8x16xf32>
    %45 = vector.extract_strided_slice %7 {offsets = [0, 16], sizes = [8, 16], strides = [1, 1]} : vector<8x32xf32> to vector<8x16xf32>
    %cst_29 = arith.constant dense<0.000000e+00> : vector<8x8xf32>
    %46 = tpu.matmul %43, %44, %cst_29 {dimension_numbers = #tpu.dot_dimension_numbers<[1], [1], [0], [0], [0, 0, 1, 0], [], []>} : vector<8x16xf32>, vector<8x16xf32>, vector<8x8xf32> -> vector<8x8xf32>
    %c1 = arith.constant 1 : index
    %c0_30 = arith.constant 0 : index
    %c0_31 = arith.constant 0 : index
    %47 = vector.load %arg8[%c1, %c0_30, %c0_31] : memref<2x8x1xf32, #tpu.memory_space<vmem>>, vector<1x8x1xf32>
    %48 = vector.shape_cast %47 : vector<1x8x1xf32> to vector<8x1xf32>
    %cst_32 = arith.constant dense<0xFF800000> : vector<8xf32>
    %49 = vector.multi_reduction <maximumf>, %46, %cst_32 [1] : vector<8x8xf32> to vector<8xf32>
    %50 = vector.shape_cast %49 : vector<8xf32> to vector<8x1xf32>
    %51 = arith.maximumf %48, %50 : vector<8x1xf32>
    %52 = arith.subf %48, %51 : vector<8x1xf32>
    %53 = math.exp %52 : vector<8x1xf32>
    %54 = vector.broadcast %51 : vector<8x1xf32> to vector<8x8xf32>
    %55 = arith.subf %46, %54 : vector<8x8xf32>
    %56 = math.exp %55 : vector<8x8xf32>
    %c1_33 = arith.constant 1 : index
    %c0_34 = arith.constant 0 : index
    %c0_35 = arith.constant 0 : index
    %57 = vector.load %arg9[%c1_33, %c0_34, %c0_35] : memref<2x8x1xf32, #tpu.memory_space<vmem>>, vector<1x8x1xf32>
    %58 = vector.shape_cast %57 : vector<1x8x1xf32> to vector<8x1xf32>
    %59 = arith.mulf %53, %58 : vector<8x1xf32>
    %cst_36 = arith.constant dense<0.000000e+00> : vector<8xf32>
    %60 = vector.multi_reduction <add>, %56, %cst_36 [1] : vector<8x8xf32> to vector<8xf32>
    %61 = vector.shape_cast %60 : vector<8xf32> to vector<8x1xf32>
    %62 = arith.addf %59, %61 : vector<8x1xf32>
    %c1_37 = arith.constant 1 : index
    %c0_38 = arith.constant 0 : index
    %c0_39 = arith.constant 0 : index
    %63 = vector.load %arg9[%c1_37, %c0_38, %c0_39] : memref<2x8x1xf32, #tpu.memory_space<vmem>>, vector<1x8x1xf32>
    %64 = vector.shape_cast %63 : vector<1x8x1xf32> to vector<8x1xf32>
    %65 = vector.shape_cast %62 : vector<8x1xf32> to vector<1x8x1xf32>
    tpu.vector_store %arg9[%c1_37, %c0_38, %c0_39], %65 {strides = array<i32>} : memref<2x8x1xf32, #tpu.memory_space<vmem>>, vector<1x8x1xf32>,
    %c1_40 = arith.constant 1 : index
    %c0_41 = arith.constant 0 : index
    %c0_42 = arith.constant 0 : index
    %66 = vector.load %arg10[%c1_40, %c0_41, %c0_42] : memref<2x8x16xf32, #tpu.memory_space<vmem>>, vector<1x8x16xf32>
    %67 = vector.shape_cast %66 : vector<1x8x16xf32> to vector<8x16xf32>
    %68 = vector.broadcast %53 : vector<8x1xf32> to vector<8x16xf32>
    %69 = arith.mulf %68, %67 : vector<8x16xf32>
    %cst_43 = arith.constant dense<0.000000e+00> : vector<8x16xf32>
    %70 = tpu.matmul %56, %45, %cst_43 {dimension_numbers = #tpu.dot_dimension_numbers<[1], [0], [0], [1], [0, 0, 1, 1], [], []>} : vector<8x8xf32>, vector<8x16xf32>, vector<8x16xf32> -> vector<8x16xf32>
    %71 = arith.addf %69, %70 : vector<8x16xf32>
    %c1_44 = arith.constant 1 : index
    %c0_45 = arith.constant 0 : index
    %c0_46 = arith.constant 0 : index
    %72 = vector.load %arg10[%c1_44, %c0_45, %c0_46] : memref<2x8x16xf32, #tpu.memory_space<vmem>>, vector<1x8x16xf32>
    %73 = vector.shape_cast %72 : vector<1x8x16xf32> to vector<8x16xf32>
    %74 = vector.shape_cast %71 : vector<8x16xf32> to vector<1x8x16xf32>
    tpu.vector_store %arg10[%c1_44, %c0_45, %c0_46], %74 {strides = array<i32>} : memref<2x8x16xf32, #tpu.memory_space<vmem>>, vector<1x8x16xf32>,
    %c1_47 = arith.constant 1 : index
    %c0_48 = arith.constant 0 : index
    %c0_49 = arith.constant 0 : index
    %75 = vector.load %arg8[%c1_47, %c0_48, %c0_49] : memref<2x8x1xf32, #tpu.memory_space<vmem>>, vector<1x8x1xf32>
    %76 = vector.shape_cast %75 : vector<1x8x1xf32> to vector<8x1xf32>
    %77 = vector.shape_cast %51 : vector<8x1xf32> to vector<1x8x1xf32>
    tpu.vector_store %arg8[%c1_47, %c0_48, %c0_49], %77 {strides = array<i32>} : memref<2x8x1xf32, #tpu.memory_space<vmem>>, vector<1x8x1xf32>,
    %c0_i32_50 = arith.constant 0 : i32
    %78 = arith.cmpi eq, %arg2, %c0_i32_50 : i32
    %79 = arith.extui %78 : i1 to i32
    %c0_i32_51 = arith.constant 0 : i32
    %80 = arith.cmpi ne, %79, %c0_i32_51 : i32
    scf.if %80 {
      %c0_52 = arith.constant 0 : index
      %c0_53 = arith.constant 0 : index
      %c0_54 = arith.constant 0 : index
      %81 = vector.load %arg9[%c0_52, %c0_53, %c0_54] : memref<2x8x1xf32, #tpu.memory_space<vmem>>, vector<1x8x1xf32>
      %82 = vector.shape_cast %81 : vector<1x8x1xf32> to vector<8x1xf32>
      %83 = tpu.reciprocal %82 {approx = true} : vector<8x1xf32> -> vector<8x1xf32>
      %84 = arith.mulf %82, %83 : vector<8x1xf32>
      %cst_55 = arith.constant 2.000000e+00 : f32
      %85 = vector.broadcast %cst_55 : f32 to vector<8x1xf32>
      %86 = arith.subf %85, %84 : vector<8x1xf32>
      %87 = arith.mulf %83, %86 : vector<8x1xf32>
      %c0_56 = arith.constant 0 : index
      %c0_57 = arith.constant 0 : index
      %c0_58 = arith.constant 0 : index
      %88 = vector.load %arg10[%c0_56, %c0_57, %c0_58] : memref<2x8x16xf32, #tpu.memory_space<vmem>>, vector<1x8x16xf32>
      %89 = vector.shape_cast %88 : vector<1x8x16xf32> to vector<8x16xf32>
      %90 = vector.broadcast %87 : vector<8x1xf32> to vector<8x16xf32>
      %91 = arith.mulf %89, %90 : vector<8x16xf32>
      %c0_59 = arith.constant 0 : index
      %c0_60 = arith.constant 0 : index
      %c0_61 = arith.constant 0 : index
      %92 = vector.load %arg6[%c0_59, %c0_60, %c0_61] : memref<1x8x32xf32, #tpu.memory_space<vmem>>, vector<1x8x16xf32>
      %93 = vector.shape_cast %92 : vector<1x8x16xf32> to vector<8x16xf32>
      %94 = vector.shape_cast %91 : vector<8x16xf32> to vector<1x8x16xf32>
      tpu.vector_store %arg6[%c0_59, %c0_60, %c0_61], %94 {strides = array<i32>} : memref<1x8x32xf32, #tpu.memory_space<vmem>>, vector<1x8x16xf32>,
      %c1_62 = arith.constant 1 : index
      %c0_63 = arith.constant 0 : index
      %c0_64 = arith.constant 0 : index
      %95 = vector.load %arg9[%c1_62, %c0_63, %c0_64] : memref<2x8x1xf32, #tpu.memory_space<vmem>>, vector<1x8x1xf32>
      %96 = vector.shape_cast %95 : vector<1x8x1xf32> to vector<8x1xf32>
      %97 = tpu.reciprocal %96 {approx = true} : vector<8x1xf32> -> vector<8x1xf32>
      %98 = arith.mulf %96, %97 : vector<8x1xf32>
      %cst_65 = arith.constant 2.000000e+00 : f32
      %99 = vector.broadcast %cst_65 : f32 to vector<8x1xf32>
      %100 = arith.subf %99, %98 : vector<8x1xf32>
      %101 = arith.mulf %97, %100 : vector<8x1xf32>
      %c1_66 = arith.constant 1 : index
      %c0_67 = arith.constant 0 : index
      %c0_68 = arith.constant 0 : index
      %102 = vector.load %arg10[%c1_66, %c0_67, %c0_68] : memref<2x8x16xf32, #tpu.memory_space<vmem>>, vector<1x8x16xf32>
      %103 = vector.shape_cast %102 : vector<1x8x16xf32> to vector<8x16xf32>
      %104 = vector.broadcast %101 : vector<8x1xf32> to vector<8x16xf32>
      %105 = arith.mulf %103, %104 : vector<8x16xf32>
      %c0_69 = arith.constant 0 : index
      %c0_70 = arith.constant 0 : index
      %c16 = arith.constant 16 : index
      %106 = vector.load %arg6[%c0_69, %c0_70, %c16] : memref<1x8x32xf32, #tpu.memory_space<vmem>>, vector<1x8x16xf32>
      %107 = vector.shape_cast %106 : vector<1x8x16xf32> to vector<8x16xf32>
      %108 = vector.shape_cast %105 : vector<8x16xf32> to vector<1x8x16xf32>
      tpu.vector_store %arg6[%c0_69, %c0_70, %c16], %108 {strides = array<i32>} : memref<1x8x32xf32, #tpu.memory_space<vmem>>, vector<1x8x16xf32>,
    } else {
    }
    return
  }
  func.func @transform_0(%arg0: i32, %arg1: i32, %arg2: i32) -> (i32, i32, i32) {
    %c0_i32 = arith.constant 0 : i32
    %c0_i32_0 = arith.constant 0 : i32
    return %arg0, %arg1, %c0_i32 : i32, i32, i32
  }
  func.func @transform_1(%arg0: i32, %arg1: i32, %arg2: i32) -> (i32, i32, i32) {
    %c0_i32 = arith.constant 0 : i32
    %c0_i32_0 = arith.constant 0 : i32
    return %arg0, %arg2, %c0_i32 : i32, i32, i32
  }
  func.func @transform_2(%arg0: i32, %arg1: i32, %arg2: i32) -> (i32, i32, i32) {
    %c0_i32 = arith.constant 0 : i32
    %c0_i32_0 = arith.constant 0 : i32
    return %arg0, %arg2, %c0_i32 : i32, i32, i32
  }
  func.func @transform_3(%arg0: i32, %arg1: i32, %arg2: i32) -> (i32, i32, i32) {
    %c0_i32 = arith.constant 0 : i32
    %c0_i32_0 = arith.constant 0 : i32
    return %arg0, %arg1, %c0_i32 : i32, i32, i32
  }
}

</mosaic_0001>

<bundles_post_ra>
// kernel: tpu_custom_call.1
= control target key start
LH: loop header
LB: loop body
LE: loop exit
PB: predicated region body
PF: predicated region fallthrough
CT: control target
= control target key end

     0   :  { %s1435_s0 = inlined_call_operand.hbm [shape: f32[2,8,32], index: 0, kind: input, shape index: {}]   ;;  %s1436_s1 = inlined_call_operand.hbm [shape: f32[2,8,32], index: 1, kind: input, shape index: {}]   ;;  %s1437_s2 = inlined_call_operand.hbm [shape: f32[2,8,32], index: 2, kind: input, shape index: {}]   ;;  %s1438_s3 = inlined_call_operand.hbm [shape: f32[2,8,32], index: 3, kind: output, shape index: {}]  }
   0x1   :  { %1442 = sst [smem:[#allocation18_spill]] %s1436_s1 }
   0x2   :  { %8 = vsyncpa [#allocation7], 0 }
   0x3   :  { %10 = vsyncpa [#allocation7 + $0x1], 0 }
   0x4   :  { %11 = vsyncpa [#allocation10], 0 }
   0x5   :  { %13 = vsyncpa [#allocation10 + $0x1], 0 }
   0x6   :  { %14 = vsyncpa [#allocation8], 0 }
   0x7   :  { %16 = vsyncpa [#allocation8 + $0x1], 0  ;;  %s1204_s12 = smov 0   ;;  %s1206_s13 = smov 0  }
   0x8   :  { %s1208_s14 = smov 0   ;;  %s1210_s15 = smov 0  }
   0x9   :  { %s1212_s16 = smov 0   ;;  %s1214_s17 = smov 0  }
   0xa LB: > { %1443 = sst [smem:[#allocation16_spill]] %s1168_s16  ;;  %s1235_s18 = sadd.s32 4294967295, %s1172_s17   ;;  %s1172_s17 = sphi %s1214_s17, %s22_s17   ;;  %s1168_s16 = sphi %s1212_s16, %s1455_s16   ;;  %s1164_s15 = sphi %s1210_s15, %s1454_s15   ;;  %s1160_s14 = sphi %s1208_s14, %s1458_s14   ;;  %s1156_s13 = sphi %s1206_s13, %s1457_s13   ;;  %s1152_s12 = sphi %s1204_s12, %s1456_s12  }
   0xb   : > { %s860_s19 = sadd.s32 4294967294, %s1172_s17   ;;  %s41_s20 = sadd.s32 1, %s1168_s16 }
   0xc   : > { %s50_s21 = sadd.s32 1, %s1160_s14  ;;  %p43_p0 = scmp.ge.s32.totalorder %s41_s20, 2 }
   0xd   : > { %p57_p1 = scmp.ne.s32.totalorder %s1160_s14, %s1156_s13  ;;  %p58_p2 = scmp.eq.s32.totalorder %s1172_s17, 0 }
   0xe   : > { %p63_p3 = scmp.ne.s32.totalorder %s1156_s13, %s1152_s12  ;;  %s1460_s20 = smov (%p43_p0, %s41_s20), 0 }
   0xf   : > { %1444 = sst [smem:[#allocation17_spill]] %s1460_s20  ;;  %p1247_p4 = por %p58_p2, %p57_p1 }
  0x10   : > { %p64_p5 = scmp.eq.s32.totalorder %s1235_s18, 0  ;;  %s45_s23 = ssub.s32 %s1168_s16, %s1460_s20 }
  0x11   : > { %p145_p6 = scmp.eq.s32.totalorder %s1235_s18, 1  ;;  %p48_p7 = scmp.eq.s32.totalorder %s45_s23, 0 }
  0x12   : > { %p1255_p8 = por %p64_p5, %p63_p3  ;;  %p151_p10 = scmp.eq.s32.totalorder %s860_s19, 1 }
  0x13   : > { %p1259_p9 = por %p145_p6, %p57_p1  ;;  %p934_p13 = scmp.lt.s32.totalorder %s1172_s17, 2 }
  0x14   : > { %s1264_s26 = scalar_select %p48_p7, %s1160_s14, %s50_s21  }
  0x15   : > { %p1266_p11 = por %p151_p10, %p63_p3  ;;  %s1439_s28 = sand.u32 1, %s1160_s14  }
  0x16   : > { %s1275_s29 = sshll.u32 %s1439_s28, 3  ;;  %s1278_s30 = sshll.u32 %s1168_s16, 7 }
  0x17   : > { %p1282_p0 = pnand %p934_p13, %p1247_p4  ;;  %s190_s5 = sand.u32 1, %s1172_s17  }
  0x18   : > { %s1450_s1 = sld [smem:[#allocation18_spill]]  ;;  %s194_s9 = scalar_lea.vmem [#allocation9], %s1275_s29 }
  0x19   : > { %s202_s10 = sshll.u32 %s194_s9, 4  ;;  %p869_p1 = scmp.ge.s32.totalorder %s1172_s17, 1  ;;  %s203_s10 = int_to_ptr.vmem [resolvable:$true] %s202_s10 }
  0x1a   : > { %p226_p2 = scmp.lt.s32.totalorder %s1172_s17, 3  ;;  %s1294_s11 = scalar_lea.sflag [#allocation10], %s190_s5 }
  0x1b   : > { %p1006_p3 = pneg %p1282_p0  ;;  %s1017_s19 = scalar_lea.vmem %s203_s10, 128 }
  0x1c   : > { %p1018_p4 = scmp.ne.s32.totalorder %s203_s10, %s1017_s19  ;;  %s1174_s21 = smov [#allocation9]  }
  0x1d   : > { %s1022_s22 = sshll.u32 %s1174_s21, 4  ;;  %s1023_s22 = int_to_ptr.vmem [resolvable:$false] %s1022_s22 }
  0x1e   : > { %s200_s8 = scalar_lea.hbm %s1450_s1, %s1278_s30  ;;  %p1020_p5 = pnand %p1018_p4, %p1006_p3 }
  0x1f   : > { %s1024_s23 = scalar_lea.vmem %s1023_s22, 256  ;;  %p1025_p7 = scmp.lt.s32.totalorder %s203_s10, %s1023_s22 }
  0x20   : > { %p1021_p6 = pneg %p1020_p5  ;;  %p1026_p10 = scmp.lt.s32.totalorder %s1024_s23, %s1017_s19 }
  0x22   : > { %p1027_p13 = por %p1026_p10, %p1025_p7 }
  0x24   : > { %p1028_p12 = pnand %p1027_p13, %p1021_p6 }
  0x26   : > { %1031 = shalt.err (!%p1028_p12)
}
  0x27   : > { %926 = dma.hbm_to_vmem [thread:$0]  (!%p1282_p0), %s200_s8, 128, %s203_s10, %s1294_s11  }
  0x28   : > { %p1308_p4 = pnand %p869_p1, %p226_p2  ;;  %s181_s9 = scalar_lea.hbm %s1435_s0, %s1278_s30 }
  0x29   : > { %s175_s19 = scalar_lea.vmem [#allocation6], %s1275_s29  ;;  %s219_s28 = scalar_lea.hbm %s1437_s2, %s1278_s30 }
  0x2a   : > { %s183_s21 = sshll.u32 %s175_s19, 4  ;;  %s1452_s1 = sand.u32 1, %s1160_s14   ;;  %s184_s21 = int_to_ptr.vmem [resolvable:$true] %s183_s21 }
  0x2b   : > { %s172_s20 = scalar_lea.sflag [#allocation7], %s1452_s1  ;;  %s1045_s8 = scalar_lea.vmem %s184_s21, 128 }
  0x2c   : > { %p1046_p12 = scmp.ne.s32.totalorder %s184_s21, %s1045_s8  ;;  %s1175_s10 = smov [#allocation6]  }
  0x2d   : > { %s1050_s16 = sshll.u32 %s1175_s10, 4  ;;  %s1051_s16 = int_to_ptr.vmem [resolvable:$false] %s1050_s16 }
  0x2e   : > { %p1048_p1 = pnand %p1046_p12, %p1006_p3  ;;  %s1052_s6 = scalar_lea.vmem %s1051_s16, 256 }
  0x2f   : > { %p1053_p5 = scmp.lt.s32.totalorder %s184_s21, %s1051_s16  ;;  %p1054_p6 = scmp.lt.s32.totalorder %s1052_s6, %s1045_s8 }
  0x30   : > { %p1049_p2 = pneg %p1048_p1 }
  0x31   : > { %p1055_p7 = por %p1054_p6, %p1053_p5 }
  0x33   : > { %p1056_p10 = pnand %p1055_p7, %p1049_p2 }
  0x35   : > { %1059 = shalt.err (!%p1056_p10)
}
  0x36   : > { %923 = dma.hbm_to_vmem [thread:$0]  (!%p1282_p0), %s181_s9, 128, %s184_s21, %s172_s20  }
  0x37   : > { %s213_s1 = scalar_lea.vmem [#allocation11], %s1275_s29  ;;  %s1176_s22 = smov [#allocation11]  }
  0x38   : > { %s221_s7 = sshll.u32 %s213_s1, 4  ;;  %s1078_s16 = sshll.u32 %s1176_s22, 4  ;;  %s222_s7 = int_to_ptr.vmem [resolvable:$true] %s221_s7  ;;  %s1079_s16 = int_to_ptr.vmem [resolvable:$false] %s1078_s16 }
  0x39   : > { %s1073_s19 = scalar_lea.vmem %s222_s7, 128  ;;  %s1080_s23 = scalar_lea.vmem %s1079_s16, 256 }
  0x3a   : > { %p1074_p13 = scmp.ne.s32.totalorder %s222_s7, %s1073_s19  ;;  %p1081_p2 = scmp.lt.s32.totalorder %s222_s7, %s1079_s16 }
  0x3b   : > { %p1082_p5 = scmp.lt.s32.totalorder %s1080_s23, %s1073_s19 }
  0x3c   : > { %p1076_p12 = pnand %p1074_p13, %p1006_p3 }
  0x3d   : > { %p1083_p6 = por %p1082_p5, %p1081_p2 }
  0x3e   : > { %p1077_p1 = pneg %p1076_p12 }
  0x40   : > { %p1084_p7 = pnand %p1083_p6, %p1077_p1 }
  0x42   : > { %1087 = shalt.err (!%p1084_p7)
}
  0x43   : > { %929 = dma.hbm_to_vmem [thread:$0]  (!%p1282_p0), %s219_s28, 128, %s222_s7, %s1294_s11  }
  0x44   : > { %230 = sbr.rel (%p1308_p4) target bundleno = 1467 (0x5bb), region = 32  ;;  %s1343_s9 = sand.u32 (!%p1308_p4), 1, %s1156_s13  }
  0x45   : > { %s1346_s21 = sshll.u32 (!%p1308_p4), %s1343_s9, 3  ;;  %s233_s4 = scalar_lea.sflag (!%p1308_p4), [#allocation7], %s1343_s9 }
  0x46   : > { %s236_s8 = scalar_lea.vmem (!%p1308_p4), [#allocation6], %s1346_s21 }
  0x49   : > { %1139 = dma.done.wait (%p1255_p8), %s233_s4, 128  }
  0x4a   : > { %1141 = vsyncadd (%p1255_p8), %s233_s4, 4294967168  ;;  %s241_s28 = sand.u32 1, %s1235_s18   ;;  %s245_s11 = scalar_lea.vmem [#allocation9], %s1346_s21 }
  0x4b   : > { %s242_s30 = scalar_lea.sflag [#allocation10], %s241_s28 }
  0x4c   : > { %1143 = dma.done.wait (%p1255_p8), %s242_s30, 256  }
  0x4d   : > { %1145 = vsyncadd (%p1255_p8), %s242_s30, 4294967040  ;;  %vm300_vm0 = vcmask 130048   ;;  %v1177_v0 = vmov 0.0   ;;  %vm1178_vm1 = vmmov 0   ;;  %v304_v1 = vld [vmem:[%s245_s11] sm:$0xff]  ;;  %v291_v2 = vld [vmem:[%s236_s8] sm:$0xff] }
  0x4e   : > { %892 = vmatprep.subr.mxu0 %v1177_v0  ;;  %301 = vst.msk [vmem:[#allocation5] sm:$0xff] %vm300_vm0, %v1177_v0  ;;  %302 = vst.msk [vmem:[#allocation5 + $0x8] sm:$0xff] %vm300_vm0, %v1177_v0  ;;  %894 = vmatprep.mubr.msk.f32.mxu0 %vm1178_vm1, %v1177_v0  ;;  %vm293_vm2 = vcmask 261120   ;;  %v292_v3 = vmul.f32 0.25, %v291_v2  ;;  %vm295_vm3 = vcmask 7168   ;;  %v1179_v5 = vmov -inf  }
  0x4f   : > { %897 = vmatprep.subr.mxu1 %v1177_v0  ;;  %899 = vmatprep.mubr.msk.f32.mxu1 %vm1178_vm1, %v1177_v0  ;;  %296 = vst.msk [vmem:[#allocation3] sm:$0xff] %vm295_vm3, %v1179_v5  ;;  %297 = vst.msk [vmem:[#allocation3 + $0x8] sm:$0xff] %vm295_vm3, %v1179_v5  ;;  %vm384_vm4 = vcmask 64512   ;;  %v1180_v9 = vmov 0   ;;  %s1181_s18 = smov 112   ;;  %s254_s24 = scalar_lea.vmem [#allocation11], %s1346_s21 }
  0x50   : > { %893 = vmatpush3.xpose.msk.msra.mxu0 %vm300_vm0, %v304_v1  ;;  %294 = vst.msk [vmem:[#allocation2] sm:$0xff] %vm293_vm2, %v292_v3  ;;  %990 = vset.pattern.permute.xlu0 %v1180_v9  ;;  %v305_v14 = vld [vmem:[%s254_s24] sm:$0xff]  ;;  %s286_s5 = scalar_lea.vmem [#allocation12], %s1346_s21  ;;  %s1182_s10 = smov 16   ;;  %vm714_vm5 = vcmask 261248  }
  0x51   : > { %907 = vmatprep.subr.mxu0 %v1177_v0  ;;  %298 = vst.msk [vmem:[#allocation4] sm:$0xff] %vm295_vm3, %v1177_v0  ;;  %299 = vst.msk [vmem:[#allocation4 + $0x8] sm:$0xff] %vm295_vm3, %v1177_v0  ;;  %991 = vset.pattern.permute.xlu1 %v1180_v9  ;;  %s881_s6 = sshll.u32 %s1164_s15, 7  ;;  %s731_s1 = sshll.u32 %s286_s5, 4  ;;  %s732_s1 = int_to_ptr.vmem [resolvable:$true] %s731_s1 }
  0x52   : > { %493 = vrot.lane.b32.xlu1 %v304_v1, %s1181_s18  ;;  %898 = vmatpush3.msra.mxu1 %v305_v14  ;;  %s1393_s22 = scalar_lea.hbm %s1438_s3, %s881_s6  ;;  %s717_s16 = scalar_lea.sflag [#allocation8], %s1343_s9 }
  0x53   : > { %902 = vmatprep.subr.mxu1 %v1177_v0  ;;  %s1088_s23 = scalar_lea.vmem %s732_s1, 128  ;;  %s1183_s20 = smov [#allocation12]  }
  0x54   : > { %p1089_p8 = scmp.ne.s32.totalorder %s732_s1, %s1088_s23  ;;  %s1092_s29 = sshll.u32 %s1183_s20, 4  ;;  %s1093_s29 = int_to_ptr.vmem [resolvable:$false] %s1092_s29 }
  0x55   : > { %v408_v55 = vld [vmem:[#allocation5] sm:$0xff]  ;;  %v595_v3 = vld [vmem:[#allocation5 + $0x8] sm:$0xff]  ;;  %s1094_s15 = scalar_lea.vmem %s1093_s29, 256  ;;  %p1095_p4 = scmp.lt.s32.totalorder %s732_s1, %s1093_s29 }
  0x56   : > { %v383_v10 = vld [vmem:[#allocation3] sm:$0xff]  ;;  %v570_v26 = vld [vmem:[#allocation3 + $0x8] sm:$0xff]  ;;  %p1090_p0 = pnand %p1089_p8, %p1259_p9  ;;  %p1096_p10 = scmp.lt.s32.totalorder %s1094_s15, %s1088_s23 }
  0x57   : > { %v303_v4 = vld [vmem:[#allocation2] sm:$0xff] }
  0x58   : > { %895 = vmatmul.mubr.msk.f32.vlgmr.msra.gmra.mxu0 %vm300_vm0, %v303_v4  ;;  %491 = vrot.lane.b32.xlu1 %v303_v4, %s1181_s18  ;;  %v400_v41 = vld [vmem:[#allocation4] sm:$0xff]  ;;  %v587_v50 = vld [vmem:[#allocation4 + $0x8] sm:$0xff]  ;;  %p1091_p3 = pneg %p1090_p0  ;;  %p1097_p13 = por %p1096_p10, %p1095_p4 }
  0x59   : > { %909 = vmatprep.mubr.msk.f32.mxu0 %vm1178_vm1, %v1177_v0 }
  0x5a   : > { %p1098_p12 = pnand %p1097_p13, %p1091_p3 }
  0xc4   : > { %v494_v18 = vpop.permute.xlu1 %493 }
  0xca   : > { %v492_v20 = vpop.permute.xlu1 %491 }
 0x118   : > { %v379_v6 = vpop.f32.mrf.mxu0 }
 0x119   : > { %v385_v7 = vsel %vm384_vm4, %v379_v6, -inf }
 0x11a   : > { %386 = vmax.xlane.f32.xlu0 %v385_v7  ;;  %v896_v8 = vpop.f32.mrf.mxu0 }
 0x1a3   : > { %v387_v11 = vpop.xlane.xlu0 %386 }
 0x1a4   : > { %v388_v12 = vmax.f32 %v383_v10, %v387_v11 }
 0x1a6   : > { %v389_v13 = vsub.f32 %v383_v10, %v388_v12  ;;  %490 = vst.msk [vmem:[#allocation3] sm:$0xff] %vm295_vm3, %v388_v12  ;;  %394 = vperm.xlu0 %990, %v388_v12  }
 0x1a8   : > { %v390_v38 = vmul.f32 1.442695, %v389_v13 }
 0x1aa   : > { %603 = vrot.lane.b32.xlu0 %v305_v14, %s1181_s18 }
 0x221   : > { %v395_v15 = vpop.permute.xlu0 %394 }
 0x222   : > { %v397_v16 = vsub.f32 %v379_v6, %v395_v15 }
 0x224   : > { %v398_v17 = vmul.f32 1.442695, %v397_v16 }
 0x225   : > { %v604_v30 = vpop.permute.xlu0 %603 }
 0x226   : > { %992 = vpow2.f32 %v398_v17  ;;  %908 = vmatpush3.msra.mxu0 %v604_v30 }
 0x233   : > { %v993_v19 = vpop.eup %992 }
 0x234   : > { %900 = vmatmul.mubr.msk.f32.vlgmr.msra.gmra.mxu1 %vm384_vm4, %v993_v19  ;;  %v402_v31 = vsel %vm384_vm4, %v993_v19, 0.0 }
 0x235   : > { %903 = vmatpush3.xpose.msk.msra.mxu1 %vm300_vm0, %v494_v18  ;;  %904 = vmatprep.mubr.msk.f32.mxu1 %vm1178_vm1, %v1177_v0 }
 0x238   : > { %905 = vmatmul.mubr.msk.f32.vlgmr.msra.gmra.mxu1 %vm300_vm0, %v492_v20 }
 0x2f4   : > { %v484_v21 = vpop.f32.mrf.mxu1 }
 0x2f6   : > { %v901_v22 = vpop.f32.mrf.mxu1 }
 0x2f8   : > { %v565_v23 = vpop.f32.mrf.mxu1 }
 0x2f9   : > { %v571_v24 = vsel %vm384_vm4, %v565_v23, -inf }
 0x2fa   : > { %572 = vmax.xlane.f32.xlu1 %v571_v24  ;;  %v906_v25 = vpop.f32.mrf.mxu1 }
 0x383   : > { %v573_v27 = vpop.xlane.xlu1 %572 }
 0x384   : > { %v574_v28 = vmax.f32 %v570_v26, %v573_v27 }
 0x386   : > { %v575_v29 = vsub.f32 %v570_v26, %v574_v28  ;;  %681 = vst.msk [vmem:[#allocation3 + $0x8] sm:$0xff] %vm295_vm3, %v574_v28  ;;  %580 = vperm.xlu1 %991, %v574_v28  }
 0x388   : > { %v576_v37 = vmul.f32 1.442695, %v575_v29 }
 0x3aa   : > { %403 = vadd.xlane.f32.xlu1 %v402_v31 }
 0x401   : > { %v581_v32 = vpop.permute.xlu1 %580 }
 0x402   : > { %v583_v33 = vsub.f32 %v565_v23, %v581_v32 }
 0x404   : > { %v584_v34 = vmul.f32 1.442695, %v583_v33 }
 0x406   : > { %994 = vpow2.f32 %v584_v34 }
 0x407   : > { %996 = vpow2.f32 %v576_v37 }
 0x408   : > { %998 = vpow2.f32 %v390_v38 }
 0x413   : > { %v995_v35 = vpop.eup %994 }
 0x414   : > { %910 = vmatmul.mubr.msk.f32.vlgmr.msra.gmra.mxu0 %vm384_vm4, %v995_v35  ;;  %v589_v36 = vsel %vm384_vm4, %v995_v35, 0.0  ;;  %v997_v39 = vpop.eup %996 }
 0x415   : > { %590 = vadd.xlane.f32.xlu0 %v589_v36  ;;  %v999_v40 = vpop.eup %998  ;;  %v588_v51 = vmul.f32 %v997_v39, %v587_v50 }
 0x416   : > { %v401_v42 = vmul.f32 %v999_v40, %v400_v41 }
 0x42b   : > { %598 = vperm.xlu0 %990, %v997_v39  }
 0x42f   : > { %411 = vperm.xlu0 %990, %v999_v40  }
 0x433   : > { %v404_v43 = vpop.xlane.xlu1 %403 }
 0x434   : > { %v405_v44 = vadd.f32 %v404_v43, %v401_v42 }
 0x436   : > { %407 = vst.msk [vmem:[#allocation4] sm:$0xff] %vm295_vm3, %v405_v44 }
 0x43d   : > { %v685_v45 = vld [vmem:[#allocation4] sm:$0xff] }
 0x43e   : > { %1000 = vrcp.f32 %v685_v45 }
 0x44b   : > { %v1001_v46 = vpop.eup %1000 }
 0x44c   : > { %v687_v47 = vmul.f32 %v1001_v46, %v685_v45 }
 0x44e   : > { %v688_v48 = vsub.f32 2.0, %v687_v47 }
 0x450   : > { %v689_v49 = vmul.f32 %v1001_v46, %v688_v48 }
 0x452   : > { %693 = vperm.xlu0 %990, %v689_v49  }
 0x49e   : > { %v591_v52 = vpop.xlane.xlu0 %590 }
 0x49f   : > { %v592_v53 = vadd.f32 %v591_v52, %v588_v51 }
 0x4a1   : > { %593 = vst.msk [vmem:[#allocation4 + $0x8] sm:$0xff] %vm295_vm3, %v592_v53 }
 0x4a6   : > { %v599_v54 = vpop.permute.xlu0 %598 }
 0x4a7   : > { %v601_v4 = vmul.f32 %v599_v54, %v595_v3 }
 0x4a8   : > { %v698_v56 = vld [vmem:[#allocation4 + $0x8] sm:$0xff] }
 0x4a9   : > { %1002 = vrcp.f32 %v698_v56 }
 0x4aa   : > { %v412_v57 = vpop.permute.xlu0 %411 }
 0x4ab   : > { %v414_v58 = vmul.f32 %v412_v57, %v408_v55 }
 0x4ad   : > { %v488_v59 = vadd.f32 %v484_v21, %v414_v58 }
 0x4af   : > { %489 = vst.msk [vmem:[#allocation5] sm:$0xff] %vm300_vm0, %v488_v59 }
 0x4b6   : > { %v1003_v60 = vpop.eup %1002  ;;  %v690_v0 = vld [vmem:[#allocation5] sm:$0xff] }
 0x4b7   : > { %v700_v61 = vmul.f32 %v1003_v60, %v698_v56 }
 0x4b9   : > { %v701_v62 = vsub.f32 2.0, %v700_v61 }
 0x4bb   : > { %v702_v63 = vmul.f32 %v1003_v60, %v701_v62 }
 0x4bd   : > { %706 = vperm.xlu1 %991, %v702_v63  }
 0x4cd   : > { %v694_v1 = vpop.permute.xlu0 %693 }
 0x4ce   : > { %v696_v2 = vmul.f32 %v694_v1, %v690_v0 }
 0x4d0   : > { %697 = vst.msk [vmem:[%s286_s5] sm:$0xff] %vm300_vm0, %v696_v2 }
 0x4d4   : > { %v675_v5 = vpop.f32.mrf.mxu0 }
 0x4d5   : > { %v679_v6 = vadd.f32 %v675_v5, %v601_v4 }
 0x4d6   : > { %v911_v7 = vpop.f32.mrf.mxu0 }
 0x4d7   : > { %680 = vst.msk [vmem:[#allocation5 + $0x8] sm:$0xff] %vm300_vm0, %v679_v6 }
 0x4de   : > { %v703_v9 = vld [vmem:[#allocation5 + $0x8] sm:$0xff] }
 0x538   : > { %v707_v8 = vpop.permute.xlu1 %706 }
 0x539   : > { %v709_v10 = vmul.f32 %v707_v8, %v703_v9 }
 0x53b   : > { %711 = vrot.lane.b32.xlu0 %v709_v10, %s1182_s10 }
 0x5ad   : > { %v712_v11 = vpop.permute.xlu0 %711 }
 0x5ae   : > { %715 = vst.msk [vmem:[%s286_s5] sm:$0xff] %vm714_vm5, %v712_v11 }
 0x5af   : > { %1101 = shalt.err (!%p1098_p12)
}
 0x5b0   : > { %s1102_s21 = scalar_lea.hbm %s1393_s22, 128  ;;  %s1106_s8 = scalar_lea.hbm %s1438_s3, 256 }
 0x5b1   : > { %p1103_p1 = scmp.ne.s32.totalorder %s1393_s22, %s1102_s21  ;;  %p1107_p6 = scmp.lt.s32.totalorder %s1393_s22, %s1438_s3 }
 0x5b2   : > { %p1108_p7 = scmp.lt.s32.totalorder %s1106_s8, %s1102_s21 }
 0x5b3   : > { %p1104_p2 = pnand %p1103_p1, %p1259_p9 }
 0x5b4   : > { %p1109_p8 = por %p1108_p7, %p1107_p6 }
 0x5b5   : > { %p1105_p5 = pneg %p1104_p2 }
 0x5b7   : > { %p1110_p0 = pnand %p1109_p8, %p1105_p5 }
 0x5b9   : > { %1113 = shalt.err (!%p1110_p0)
}
 0x5ba   : > { %918 = dma.vmem_to_hbm [thread:$0]  (%p1259_p9), %s732_s1, 128, %s1393_s22, %s717_s16  }
 0x5bb PF: > { %s743_s11 = sand.u32 1, %s1152_s12   ;;  %p1453_p3 = scmp.ge.s32.totalorder %s1172_s17, 2 }
 0x5bc   : > { %s744_s18 = scalar_lea.sflag [#allocation8], %s743_s11 }
 0x5bd   : > { %p931_p4 = pnand %p1453_p3, %p1266_p11 }
 0x5bf   : > { %p932_p10 = pneg %p931_p4 }
 0x5c1   : > { %1147 = dma.done.wait (%p932_p10), %s744_s18, 128  }
 0x5c2   : > { %1149 = vsyncadd (%p932_p10), %s744_s18, 4294967168  ;;  %s22_s17 = sadd.s32 1, %s1172_s17   ;;  %s1454_s15 = sld [smem:[#allocation16_spill]] }
 0x5c3   : > { %p19_p13 = scmp.ge.s32.totalorder %s22_s17, 4   ;;  %s1455_s16 = sld [smem:[#allocation17_spill]] }
 0x5c4   : > { %s1456_s12 = smov %s1156_s13  ;;  %s1457_s13 = smov %s1160_s14 }
 0x5c5   : > { %s1458_s14 = smov %s1264_s26  ;;  %21 = sbr.rel (!%p19_p13) target bundleno = 10 (0xa), region = 112 }
 0x5ca   :  { %749 = vsyncpa [#allocation7], 1 }
 0x5cb   :  { %751 = vsyncpa [#allocation7 + $0x1], 1 }
 0x5cc   :  { %752 = vsyncpa [#allocation10], 1 }
 0x5cd   :  { %754 = vsyncpa [#allocation10 + $0x1], 1 }
 0x5ce   :  { %755 = vsyncpa [#allocation8], 1 }
 0x5cf   :  { %757 = vsyncpa [#allocation8 + $0x1], 1 }

</bundles_post_ra>
